<compile_context>
chip_gen: v6e
topology: v6e:2x2x1
jax: 0.10.0
libtpu: 0.0.40
codegen_flags: <defaults>
</compile_context>

<pallas_src>
import jax
import jax.numpy as jnp
from jax.experimental import pallas as pl
from jax.experimental.pallas import tpu as pltpu


# ----------------------------------------------------------------------------
# Parameter / buffer construction (glue, mirrors TPSGridGen.__init__, runs once)
# ----------------------------------------------------------------------------
def compute_partial_repr(input_points, control_points):
    """phi(x1, x2) = r^2 * log(r) = 0.5 * d * log(d), d = ||x1-x2||^2 ; NaN -> 0."""
    diff = input_points[:, None, :] - control_points[None, :, :]
    dist = jnp.sum(diff * diff, axis=-1)
    safe = jnp.where(dist > 0.0, dist, 1.0)
    repr_matrix = 0.5 * dist * jnp.log(safe)
    return jnp.where(dist > 0.0, repr_matrix, 0.0).astype(jnp.float32)


def build_tps_buffers(target_height, target_width, target_control_points):
    """Returns (A_N^T (N, HW), inverse_kernel (N+3,N+3), tcr (HW, N+3)).

    A = target_coordinate_repr @ inv(forward_kernel); because Y is padded with
    three zero rows, only the first N columns of A contribute:
        coords[b, :, c] = A[:, :N] @ source_control_points[b, :, c].
    We return A_N^T so the kernel can produce a lane-dense (2B, HW) output.
    """
    tcp = target_control_points.astype(jnp.float32)
    N = tcp.shape[0]

    # forward_kernel
    fk = jnp.zeros((N + 3, N + 3), jnp.float32)
    fk = fk.at[:N, :N].set(compute_partial_repr(tcp, tcp))
    fk = fk.at[:N, N].set(1.0)          # column -3
    fk = fk.at[N, :N].set(1.0)          # row -3
    fk = fk.at[:N, N + 1:].set(tcp)     # last two columns
    fk = fk.at[N + 1:, :N].set(tcp.T)   # last two rows

    # target coordinate representation (same ordering as itertools.product(H, W))
    HW = target_height * target_width
    yy, xx = jnp.meshgrid(
        jnp.arange(target_height, dtype=jnp.float32),
        jnp.arange(target_width, dtype=jnp.float32),
        indexing="ij",
    )
    Y = yy.reshape(HW, 1) * 2.0 / (target_height - 1) - 1.0
    X = xx.reshape(HW, 1) * 2.0 / (target_width - 1) - 1.0
    target_coordinate = jnp.concatenate([X, Y], axis=1)  # (HW, 2), order [X, Y]
    tc_partial = compute_partial_repr(target_coordinate, tcp)  # (HW, N)
    target_coordinate_repr = jnp.concatenate(
        [tc_partial, jnp.ones((HW, 1), jnp.float32), target_coordinate], axis=1
    )  # (HW, N+3)

    # A^T = inv(fk)^T @ tcr^T  computed via solve (better conditioning than inv).
    a_t = jnp.linalg.solve(fk.T, target_coordinate_repr.T)  # (N+3, HW)
    a_n_t = a_t[:N, :].astype(jnp.float32)                  # (N, HW)

    # inverse_kernel returned only for the reference check in __main__.
    inverse_kernel = jnp.linalg.inv(fk).astype(jnp.float32)
    return a_n_t, inverse_kernel, target_coordinate_repr


# ----------------------------------------------------------------------------
# Pallas kernel: single matmul, lane-dense output
# ----------------------------------------------------------------------------
def _tps_kernel(scp_t_ref, a_t_ref, out_ref):
    # scp_t_ref: (R, N)   a_t_ref: (N, tile_hw)   out_ref: (R, tile_hw)
    out_ref[...] = jnp.dot(
        scp_t_ref[...], a_t_ref[...], preferred_element_type=jnp.float32
    ).astype(out_ref.dtype)


def tps_grid_gen_forward(source_control_points, a_n_t, *, tile_hw=None):
    """source_control_points: (B, N, 2) float32 -> (B, HW, 2) float32."""
    assert source_control_points.ndim == 3
    B, N, two = source_control_points.shape
    assert two == 2
    Nk, HW = a_n_t.shape
    assert Nk == N

    # Pack all batches + coordinate channels into one lane-friendly operand:
    # scp_t[b*2 + c, n] = source_control_points[b, n, c]   -> (2B, N)
    rows = 2 * B
    scp_t = (
        source_control_points.astype(jnp.float32).transpose(0, 2, 1).reshape(rows, N)
    )
    # Pad rows to a multiple of 8 so output stores are sublane-aligned.
    rows_p = ((rows + 7) // 8) * 8
    if rows_p != rows:
        scp_t = jnp.pad(scp_t, ((0, rows_p - rows), (0, 0)))

    # Tile HW only when it is large; one block at the demo resolution.
    if tile_hw is None:
        tile_hw = HW
        if HW > 2048 and HW % 128 == 0:
            for t in range(2048, 127, -128):
                if HW % t == 0:
                    tile_hw = t
                    break
    assert HW % tile_hw == 0
    grid = (HW // tile_hw,)

    out_t = pl.pallas_call(
        _tps_kernel,
        out_shape=jax.ShapeDtypeStruct((rows_p, HW), jnp.float32),
        grid=grid,
        in_specs=[
            pl.BlockSpec((rows_p, N), lambda h: (0, 0)),      # resident across HW tiles
            pl.BlockSpec((N, tile_hw), lambda h: (0, h)),
        ],
        out_specs=pl.BlockSpec((rows_p, tile_hw), lambda h: (0, h)),
        compiler_params=pltpu.CompilerParams(
            dimension_semantics=("parallel",)
        ),
    )(scp_t, a_n_t)

    # Drop row padding and return the module's (B, HW, 2) layout
    # (cheap layout plumbing handled by XLA outside the kernel).
    out_t = out_t[:rows]
    return out_t.reshape(B, 2, HW).transpose(0, 2, 1)


# ----------------------------------------------------------------------------
# Main
# ----------------------------------------------------------------------------
if __name__ == "__main__":
    # Deterministic module configuration.
    target_height, target_width = 16, 16
    grid_size = 4  # 4x4 = 16 control points
    r = jnp.linspace(-1.0, 1.0, grid_size, dtype=jnp.float32)
    gy, gx = jnp.meshgrid(r, r, indexing="ij")
    target_control_points = jnp.stack(
        [gx.reshape(-1), gy.reshape(-1)], axis=1
    )  # (16, 2) in [-1, 1]^2

    a_n_t, inverse_kernel, target_coordinate_repr = build_tps_buffers(
        target_height, target_width, target_control_points
    )

    # Example forward input: small perturbation of the target control points.
    B, N = 2, target_control_points.shape[0]
    key = jax.random.PRNGKey(0)
    noise = 0.1 * jax.random.normal(key, (B, N, 2), dtype=jnp.float32)
    source_control_points = target_control_points[None, :, :] + noise  # (2, 16, 2)

    out = tps_grid_gen_forward(source_control_points, a_n_t)
    out = jax.block_until_ready(out)

    # Silent correctness check against a pure-JAX reference of the ORIGINAL
    # two-matmul forward pass (with the zero-padded affine rows).
    Y_ref = jnp.concatenate(
        [source_control_points, jnp.zeros((B, 3, 2), jnp.float32)], axis=1
    )
    mapping_ref = jnp.einsum("ij,bjk->bik", inverse_kernel, Y_ref)
    ref = jnp.einsum("hj,bjk->bhk", target_coordinate_repr, mapping_ref)
    assert out.shape == (B, target_height * target_width, 2)
    assert jnp.allclose(out, ref, atol=1e-3, rtol=1e-3)

    print("KERNEL_OK")
</pallas_src>

<mosaic_0001>
module attributes {stable_mosaic.version = 11 : i64} {
  func.func @_tps_kernel(%arg0: i32, %arg1: memref<8x16xf32, #tpu.memory_space<vmem>>, %arg2: memref<16x256xf32, #tpu.memory_space<vmem>>, %arg3: memref<8x256xf32, #tpu.memory_space<vmem>>) attributes {dimension_semantics = [#tpu.dimension_semantics<parallel>], iteration_bounds = array<i64: 1>, scalar_prefetch = 0 : i64, scratch_operands = 0 : i64, tpu.core_type = #tpu.core_type<tc>, window_params = [{pipeline_mode = #tpu.pipeline_mode<synchronous>, transform_indices = @transform_0, window_bounds = array<i64: 8, 16>}, {transform_indices = @transform_1, window_bounds = array<i64: 16, 256>}, {transform_indices = @transform_2, window_bounds = array<i64: 8, 256>}]} {
    %c0 = arith.constant 0 : index
    %c0_0 = arith.constant 0 : index
    %0 = vector.load %arg1[%c0, %c0_0] : memref<8x16xf32, #tpu.memory_space<vmem>>, vector<8x16xf32>
    %c0_1 = arith.constant 0 : index
    %c0_2 = arith.constant 0 : index
    %1 = vector.load %arg2[%c0_1, %c0_2] : memref<16x256xf32, #tpu.memory_space<vmem>>, vector<16x256xf32>
    %cst = arith.constant dense<0.000000e+00> : vector<8x256xf32>
    %2 = tpu.matmul %0, %1, %cst {dimension_numbers = #tpu.dot_dimension_numbers<[1], [0], [0], [1], [0, 0, 1, 1], [], []>} : vector<8x16xf32>, vector<16x256xf32>, vector<8x256xf32> -> vector<8x256xf32>
    %c0_3 = arith.constant 0 : index
    %c0_4 = arith.constant 0 : index
    %3 = vector.load %arg3[%c0_3, %c0_4] : memref<8x256xf32, #tpu.memory_space<vmem>>, vector<8x256xf32>
    tpu.vector_store %arg3[%c0_3, %c0_4], %2 {strides = array<i32>} : memref<8x256xf32, #tpu.memory_space<vmem>>, vector<8x256xf32>,
    return
  }
  func.func @transform_0(%arg0: i32) -> (i32, i32) {
    %c0_i32 = arith.constant 0 : i32
    %c0_i32_0 = arith.constant 0 : i32
    %c0_i32_1 = arith.constant 0 : i32
    return %c0_i32, %c0_i32_0 : i32, i32
  }
  func.func @transform_1(%arg0: i32) -> (i32, i32) {
    %c0_i32 = arith.constant 0 : i32
    %c0_i32_0 = arith.constant 0 : i32
    return %c0_i32, %arg0 : i32, i32
  }
  func.func @transform_2(%arg0: i32) -> (i32, i32) {
    %c0_i32 = arith.constant 0 : i32
    %c0_i32_0 = arith.constant 0 : i32
    return %c0_i32, %arg0 : i32, i32
  }
}

</mosaic_0001>

<bundles_post_ra>
// kernel: tpu_custom_call.1
= control target key start
LH: loop header
LB: loop body
LE: loop exit
PB: predicated region body
PF: predicated region fallthrough
CT: control target
= control target key end

     0   :  { %7 = vsyncpa [#allocation3], 0  ;;  %s239_s0 = inlined_call_operand.hbm [shape: f32[8,16], index: 0, kind: input, shape index: {}]   ;;  %s240_s1 = inlined_call_operand.hbm [shape: f32[16,256], index: 1, kind: input, shape index: {}]   ;;  %s241_s2 = inlined_call_operand.hbm [shape: f32[8,256], index: 2, kind: output, shape index: {}]  }
   0x1   :  { %8 = vsyncpa [#allocation6], 0 }
   0x2   :  { %9 = vsyncpa [#allocation4], 0  ;;  %s209_s9 = smov [#allocation2]   ;;  %s210_s11 = smov [#allocation5]  }
   0x3   :  { %s16_s10 = sshll.u32 %s209_s9, 4  ;;  %s25_s12 = sshll.u32 %s210_s11, 4  ;;  %s17_s10 = int_to_ptr.vmem [resolvable:$true] %s16_s10  ;;  %s26_s12 = int_to_ptr.vmem [resolvable:$true] %s25_s12 }
   0x4   :  { %s151_s13 = scalar_lea.vmem %s17_s10, 128  ;;  %p156_p1 = scmp.lt.s32.totalorder %s17_s10, %s17_s10 }
   0x5   :  { %p152_p0 = scmp.ne.s32.totalorder %s17_s10, %s151_s13  ;;  %p157_p2 = scmp.lt.s32.totalorder %s151_s13, %s151_s13 }
   0x7   :  { %p158_p3 = por %p157_p2, %p156_p1 }
   0x9   :  { %p159_p4 = pnand %p158_p3, %p152_p0 }
   0xb   :  { %162 = shalt.err (!%p159_p4)
}
   0xc   :  { %19 = dma.hbm_to_vmem [thread:$0]  %s239_s0, 128, %s17_s10, [#allocation3]  }
   0xd   :  { %s171_s16 = scalar_lea.vmem %s26_s12, 512  ;;  %p176_p6 = scmp.lt.s32.totalorder %s26_s12, %s26_s12 }
   0xe   :  { %p172_p5 = scmp.ne.s32.totalorder %s26_s12, %s171_s16  ;;  %p177_p7 = scmp.lt.s32.totalorder %s171_s16, %s171_s16 }
  0x10   :  { %p178_p8 = por %p177_p7, %p176_p6 }
  0x12   :  { %p179_p9 = pnand %p178_p8, %p172_p5 }
  0x14   :  { %182 = shalt.err (!%p179_p9)
}
  0x15   :  { %s211_s17 = smov 256   ;;  %s212_s18 = smov 16  }
  0x16   :  { %31 = dma.hbm_to_vmem [thread:$0]  %s240_s1, 512, %s26_s12, [#allocation6], %s211_s17, %s211_s17, %s212_s18  }
  0x17   :  { %203 = dma.done.wait [#allocation3], 128  }
  0x18   :  { %204 = vsyncadd [#allocation3], 4294967168 }
  0x19   :  { %205 = dma.done.wait [#allocation6], 512  }
  0x1a   :  { %206 = vsyncadd [#allocation6], 4294966784  ;;  %v213_v0 = vmov 0.0   ;;  %v42_v1 = vld [vmem:[#allocation5 + $0x18] sm:$0xff]  ;;  %v41_v2 = vld [vmem:[#allocation5 + $0x10] sm:$0xff]  ;;  %vm43_vm0 = vcmask 130048  }
  0x1b   :  { %111 = vmatprep.mubr.f32.mxu0 %v213_v0  ;;  %v40_v3 = vld [vmem:[#allocation5 + $0x8] sm:$0xff]  ;;  %75 = vmatprep.subr.mxu0 %v42_v1  ;;  %v39_v4 = vld [vmem:[#allocation5] sm:$0xff]  ;;  %v38_v5 = vld [vmem:[#allocation2] sm:$0xff]  ;;  %s214_s0 = smov [#allocation7]  }
  0x1c   :  { %76 = vmatpush1.msra.mxu0 %v41_v2  ;;  %s126_s21 = sshll.u32 %s214_s0, 4  ;;  %s127_s21 = int_to_ptr.vmem [resolvable:$true] %s126_s21 }
  0x1d   :  { %77 = vmatprep.subr.mxu0 %v40_v3  ;;  %s183_s1 = scalar_lea.vmem %s127_s21, 256  ;;  %p188_p11 = scmp.lt.s32.totalorder %s127_s21, %s127_s21 }
  0x1e   :  { %78 = vmatpush1.msra.mxu0 %v39_v4  ;;  %p184_p10 = scmp.ne.s32.totalorder %s127_s21, %s183_s1  ;;  %p189_p12 = scmp.lt.s32.totalorder %s183_s1, %s183_s1 }
  0x1f   :  { %136 = vmatmul.mubr.msk.f32.vlgmr.msra.gmra.mxu0 %vm43_vm0, %v38_v5 }
  0x20   :  { %p190_p13 = por %p189_p12, %p188_p11 }
  0x22   :  { %p191_p0 = pnand %p190_p13, %p184_p10 }
  0xdf   :  { %v113_v6 = vpop.f32.mrf.mxu0 }
  0xe0   :  { %118 = vst [vmem:[#allocation7] sm:$0xff] %v113_v6 }
  0xe1   :  { %v115_v7 = vpop.f32.mrf.mxu0 }
  0xe2   :  { %119 = vst [vmem:[#allocation7 + $0x8] sm:$0xff] %v115_v7 }
  0xe3   :  { %194 = shalt.err (!%p191_p0)
}
  0xe4   :  { %129 = dma.vmem_to_hbm [thread:$0]  %s127_s21, 256, %s241_s2, [#allocation4]  }
  0xe5   :  { %207 = dma.done.wait [#allocation4], 256  }
  0xe6   :  { %208 = vsyncadd [#allocation4], 4294967040 }
  0xe7   :  { %133 = vsyncpa [#allocation3], 1 }
  0xe8   :  { %134 = vsyncpa [#allocation6], 1 }
  0xe9   :  { %135 = vsyncpa [#allocation4], 1 }

</bundles_post_ra>
